<compile_context>
chip_gen: v6e
topology: v6e:2x2x1
jax: 0.10.0
libtpu: 0.0.40
codegen_flags: <defaults>
</compile_context>

<pallas_src>
import jax
import jax.numpy as jnp
from jax.experimental import pallas as pl
from jax.experimental.pallas import tpu as pltpu

_BN_EPS = 1e-5  # torch.nn.BatchNorm1d default eps
_LANE = 128


def _pointnet_kernel(w_ref, b_ref, x_ref, m_ref, o_ref):
    # w_ref: (Cout, Cin)   BN-folded 1x1-conv weight
    # b_ref: (Cout, 1)     BN-folded bias
    # x_ref: (Cin, T)      points block (channel-major, points on lanes)
    # m_ref: (1, T)        mask block
    # o_ref: (Cout, T)
    w = w_ref[...]
    x = x_ref[...].astype(w.dtype)
    acc = jnp.dot(w, x, preferred_element_type=jnp.float32)        # MXU, (Cout, T)
    y = jnp.maximum(acc + b_ref[...].astype(jnp.float32), 0.0)     # bias + ReLU
    y = y * m_ref[...].astype(jnp.float32)                         # mask
    o_ref[...] = y.astype(o_ref.dtype)


def pointnet_forward(points_feature, points_mask, conv_weight,
                     bn_gamma, bn_beta, bn_mean, bn_var, eps=_BN_EPS):
    """
    points_feature: (B, N, Cin)
    points_mask:    (B, N)
    conv_weight:    (Cout, Cin)    (Conv1d kernel_size=1, bias=False weight, squeezed)
    bn_*:           (Cout,)        eval-mode BatchNorm1d parameters / running stats
    Returns:        (B, Cout, N)   matching the PyTorch forward's output layout.
    """
    B, N, Cin = points_feature.shape
    Cout = conv_weight.shape[0]
    dtype = points_feature.dtype

    # Fold eval-mode BN into the 1x1 conv: y = (W x) * scale + shift.
    scale = bn_gamma / jnp.sqrt(bn_var + eps)                        # (Cout,)
    w_eff = (conv_weight * scale[:, None]).astype(jnp.float32)       # (Cout, Cin)
    b_eff = (bn_beta - bn_mean * scale).astype(jnp.float32)[:, None]  # (Cout, 1)

    # Channel-major layout: points -> lane dimension.
    x = jnp.transpose(points_feature, (0, 2, 1))                     # (B, Cin, N)
    m = points_mask.reshape(B, 1, N).astype(dtype)                   # (B, 1, N)

    # Pad points axis to a multiple of 128 (lane-dense, unmasked stores).
    Np = ((N + _LANE - 1) // _LANE) * _LANE
    if Np != N:
        x = jnp.pad(x, ((0, 0), (0, 0), (0, Np - N)))
        m = jnp.pad(m, ((0, 0), (0, 0), (0, Np - N)))  # mask=0 -> padded outputs are 0

    # Pick a lane tile: largest of {2048,...,128} dividing Np, then shrink until the
    # double-buffered in+mask+out footprint fits a conservative 16 MiB budget (v7x-safe).
    T = _LANE
    for cand in (2048, 1024, 512, 256, 128):
        if Np % cand == 0:
            T = cand
            break
    elt = jnp.dtype(dtype).itemsize
    while T > _LANE and 2 * (Cin + Cout + 1) * T * elt > (16 << 20):
        T //= 2

    # Explicit VMEM limit: pipelined tiles + weights, with headroom; capped for v7x.
    vmem_needed = (2 * (Cin + Cout + 1) * T * elt          # double-buffered x, mask, out
                   + 2 * Cout * (Cin + 1) * 4)             # w_eff + b_eff buffers
    vmem_limit = int(min(max(2 * vmem_needed, 16 << 20), 64 << 20))

    grid = (B, Np // T)

    out = pl.pallas_call(
        _pointnet_kernel,
        out_shape=jax.ShapeDtypeStruct((B, Cout, Np), dtype),
        grid_spec=pltpu.PrefetchScalarGridSpec(
            num_scalar_prefetch=0,
            grid=grid,
            in_specs=[
                pl.BlockSpec((Cout, Cin), lambda b, j: (0, 0)),            # weight
                pl.BlockSpec((Cout, 1), lambda b, j: (0, 0)),              # bias
                pl.BlockSpec((pl.Squeezed(), Cin, T), lambda b, j: (b, 0, j)),  # x
                pl.BlockSpec((pl.Squeezed(), 1, T), lambda b, j: (b, 0, j)),    # mask
            ],
            out_specs=pl.BlockSpec((pl.Squeezed(), Cout, T), lambda b, j: (b, 0, j)),
        ),
        compiler_params=pltpu.CompilerParams(
            dimension_semantics=("parallel", "parallel"),
            vmem_limit_bytes=vmem_limit,
        ),
    )(w_eff, b_eff, x, m)

    return out[:, :, :N]


if __name__ == "__main__":
    # TODO(synk): BatchNorm1d training-mode batch statistics are not implemented;
    # the kernel uses eval-mode running stats folded into the 1x1 conv.
    key = jax.random.PRNGKey(0)
    B, Npts, idims, odims = 2, 256, 64, 64
    k1, k2, k3, k4, k5, k6, k7 = jax.random.split(key, 7)

    points_feature = jax.random.normal(k1, (B, Npts, idims), dtype=jnp.float32)
    points_mask = (jax.random.uniform(k2, (B, Npts)) > 0.3).astype(jnp.float32)
    conv_w = jax.random.normal(k3, (odims, idims), dtype=jnp.float32) * 0.1
    gamma = jax.random.uniform(k4, (odims,), minval=0.5, maxval=1.5).astype(jnp.float32)
    beta = (jax.random.normal(k5, (odims,)) * 0.1).astype(jnp.float32)
    r_mean = (jax.random.normal(k6, (odims,)) * 0.1).astype(jnp.float32)
    r_var = jax.random.uniform(k7, (odims,), minval=0.5, maxval=1.5).astype(jnp.float32)

    out = pointnet_forward(points_feature, points_mask, conv_w, gamma, beta, r_mean, r_var)
    out = jax.block_until_ready(out)

    # Plain-JAX reference (unfused, same eval-mode math as the PyTorch module).
    x_t = jnp.transpose(points_feature, (0, 2, 1))                       # (B, Cin, N)
    conv = jnp.einsum('oi,bin->bon', conv_w, x_t,
                      precision=jax.lax.Precision.HIGHEST)               # (B, Cout, N)
    s = gamma / jnp.sqrt(r_var + _BN_EPS)
    bn = conv * s[None, :, None] + (beta - r_mean * s)[None, :, None]
    ref = jnp.maximum(bn, 0.0) * points_mask[:, None, :]

    assert out.shape == (B, odims, Npts) and out.dtype == points_feature.dtype
    assert jnp.allclose(out, ref, atol=1e-3, rtol=1e-3)
    print("KERNEL_OK")
</pallas_src>

<mosaic_0001>
module attributes {stable_mosaic.version = 11 : i64} {
  func.func @_pointnet_kernel(%arg0: i32, %arg1: i32, %arg2: memref<64x64xf32, #tpu.memory_space<vmem>>, %arg3: memref<64x1xf32, #tpu.memory_space<vmem>>, %arg4: memref<1x64x256xf32, #tpu.memory_space<vmem>>, %arg5: memref<1x1x256xf32, #tpu.memory_space<vmem>>, %arg6: memref<1x64x256xf32, #tpu.memory_space<vmem>>) attributes {dimension_semantics = [#tpu.dimension_semantics<parallel>, #tpu.dimension_semantics<parallel>], iteration_bounds = array<i64: 2, 1>, scalar_prefetch = 0 : i64, scratch_operands = 0 : i64, tpu.core_type = #tpu.core_type<tc>, window_params = [{pipeline_mode = #tpu.pipeline_mode<synchronous>, transform_indices = @transform_0, window_bounds = array<i64: 64, 64>}, {pipeline_mode = #tpu.pipeline_mode<synchronous>, transform_indices = @transform_1, window_bounds = array<i64: 64, 1>}, {transform_indices = @transform_2, window_bounds = array<i64: 1, 64, 256>}, {transform_indices = @transform_3, window_bounds = array<i64: 1, 1, 256>}, {transform_indices = @transform_4, window_bounds = array<i64: 1, 64, 256>}]} {
    %c0 = arith.constant 0 : index
    %c0_0 = arith.constant 0 : index
    %0 = vector.load %arg2[%c0, %c0_0] : memref<64x64xf32, #tpu.memory_space<vmem>>, vector<64x64xf32>
    %c0_1 = arith.constant 0 : index
    %c0_2 = arith.constant 0 : index
    %c0_3 = arith.constant 0 : index
    %1 = vector.load %arg4[%c0_1, %c0_2, %c0_3] : memref<1x64x256xf32, #tpu.memory_space<vmem>>, vector<1x64x256xf32>
    %2 = vector.shape_cast %1 : vector<1x64x256xf32> to vector<64x256xf32>
    %cst = arith.constant dense<0.000000e+00> : vector<64x256xf32>
    %3 = tpu.matmul %0, %2, %cst {dimension_numbers = #tpu.dot_dimension_numbers<[1], [0], [0], [1], [0, 0, 1, 1], [], []>} : vector<64x64xf32>, vector<64x256xf32>, vector<64x256xf32> -> vector<64x256xf32>
    %c0_4 = arith.constant 0 : index
    %c0_5 = arith.constant 0 : index
    %4 = vector.load %arg3[%c0_4, %c0_5] : memref<64x1xf32, #tpu.memory_space<vmem>>, vector<64x1xf32>
    %5 = vector.broadcast %4 : vector<64x1xf32> to vector<64x256xf32>
    %6 = arith.addf %3, %5 : vector<64x256xf32>
    %cst_6 = arith.constant 0.000000e+00 : f32
    %7 = vector.broadcast %cst_6 : f32 to vector<64x256xf32>
    %8 = arith.maximumf %6, %7 : vector<64x256xf32>
    %c0_7 = arith.constant 0 : index
    %c0_8 = arith.constant 0 : index
    %c0_9 = arith.constant 0 : index
    %9 = vector.load %arg5[%c0_7, %c0_8, %c0_9] : memref<1x1x256xf32, #tpu.memory_space<vmem>>, vector<1x1x256xf32>
    %10 = vector.shape_cast %9 : vector<1x1x256xf32> to vector<1x256xf32>
    %11 = vector.broadcast %10 : vector<1x256xf32> to vector<64x256xf32>
    %12 = arith.mulf %8, %11 : vector<64x256xf32>
    %c0_10 = arith.constant 0 : index
    %c0_11 = arith.constant 0 : index
    %c0_12 = arith.constant 0 : index
    %13 = vector.load %arg6[%c0_10, %c0_11, %c0_12] : memref<1x64x256xf32, #tpu.memory_space<vmem>>, vector<1x64x256xf32>
    %14 = vector.shape_cast %13 : vector<1x64x256xf32> to vector<64x256xf32>
    %15 = vector.shape_cast %12 : vector<64x256xf32> to vector<1x64x256xf32>
    tpu.vector_store %arg6[%c0_10, %c0_11, %c0_12], %15 {strides = array<i32>} : memref<1x64x256xf32, #tpu.memory_space<vmem>>, vector<1x64x256xf32>,
    return
  }
  func.func @transform_0(%arg0: i32, %arg1: i32) -> (i32, i32) {
    %c0_i32 = arith.constant 0 : i32
    %c0_i32_0 = arith.constant 0 : i32
    %c0_i32_1 = arith.constant 0 : i32
    return %c0_i32, %c0_i32_0 : i32, i32
  }
  func.func @transform_1(%arg0: i32, %arg1: i32) -> (i32, i32) {
    %c0_i32 = arith.constant 0 : i32
    %c0_i32_0 = arith.constant 0 : i32
    %c0_i32_1 = arith.constant 0 : i32
    return %c0_i32, %c0_i32_0 : i32, i32
  }
  func.func @transform_2(%arg0: i32, %arg1: i32) -> (i32, i32, i32) {
    %c0_i32 = arith.constant 0 : i32
    %c0_i32_0 = arith.constant 0 : i32
    return %arg0, %c0_i32, %arg1 : i32, i32, i32
  }
  func.func @transform_3(%arg0: i32, %arg1: i32) -> (i32, i32, i32) {
    %c0_i32 = arith.constant 0 : i32
    %c0_i32_0 = arith.constant 0 : i32
    return %arg0, %c0_i32, %arg1 : i32, i32, i32
  }
  func.func @transform_4(%arg0: i32, %arg1: i32) -> (i32, i32, i32) {
    %c0_i32 = arith.constant 0 : i32
    %c0_i32_0 = arith.constant 0 : i32
    return %arg0, %c0_i32, %arg1 : i32, i32, i32
  }
}

</mosaic_0001>

<bundles_post_ra>
// kernel: tpu_custom_call.1
= control target key start
LH: loop header
LB: loop body
LE: loop exit
PB: predicated region body
PF: predicated region fallthrough
CT: control target
= control target key end

     0   :  { %9 = vsyncpa [#allocation3], 0  ;;  %s1192_s0 = inlined_call_operand.vmem [shape: f32[64,64], index: 0, kind: input, shape index: {}]   ;;  %s1193_s1 = inlined_call_operand.vmem [shape: f32[64,1], index: 1, kind: input, shape index: {}]   ;;  %s1194_s2 = inlined_call_operand.hbm [shape: f32[2,64,256], index: 2, kind: input, shape index: {}]   ;;  %s1195_s3 = inlined_call_operand.vmem [shape: f32[2,1,256], index: 3, kind: input, shape index: {}]   ;;  %s1196_s4 = inlined_call_operand.hbm [shape: f32[2,64,256], index: 4, kind: output, shape index: {}]  }
   0x1   :  { %11 = vsyncpa [#allocation3 + $0x1], 0 }
   0x2   :  { %12 = vsyncpa [#allocation4], 0 }
   0x3   :  { %14 = vsyncpa [#allocation4 + $0x1], 0  ;;  %s912_s15 = smov 0   ;;  %s914_s16 = smov 0  }
   0x4   :  { %s916_s17 = smov 0   ;;  %s918_s18 = smov 0  }
   0x5   :  { %s920_s19 = smov 0   ;;  %s922_s20 = smov 0  }
   0x6 LB: > { %s657_s21 = sadd.s32 4294967295, %s877_s20   ;;  %s658_s22 = sadd.s32 4294967294, %s877_s20   ;;  %s877_s20 = sphi %s922_s20, %s20_s20   ;;  %s873_s19 = sphi %s920_s19, %s1207_s19   ;;  %s869_s18 = sphi %s918_s18, %s1206_s18   ;;  %s865_s17 = sphi %s916_s17, %s1205_s17   ;;  %s861_s16 = sphi %s914_s16, %s1204_s16   ;;  %s857_s15 = sphi %s912_s15, %s1203_s15  }
   0x7   : > { %s32_s23 = sadd.s32 1, %s873_s19  ;;  %s83_s24 = sadd.s32 1, %s865_s17 }
   0x8   : > { %p34_p0 = scmp.ge.s32.totalorder %s32_s23, 2  ;;  %p90_p1 = scmp.ne.s32.totalorder %s865_s17, %s861_s16 }
   0x9   : > { %p91_p2 = scmp.eq.s32.totalorder %s877_s20, 0  ;;  %p96_p3 = scmp.ne.s32.totalorder %s861_s16, %s857_s15 }
   0xa   : > { %s1209_s23 = smov (%p34_p0, %s32_s23), 0  ;;  %p97_p5 = scmp.eq.s32.totalorder %s657_s21, 0 }
   0xb   : > { %p953_p4 = por %p91_p2, %p90_p1  ;;  %s78_s26 = ssub.s32 %s873_s19, %s1209_s23 }
   0xc   : > { %p150_p6 = scmp.eq.s32.totalorder %s657_s21, 1  ;;  %p81_p7 = scmp.eq.s32.totalorder %s78_s26, 0 }
   0xd   : > { %p959_p8 = por %p97_p5, %p96_p3  ;;  %p156_p10 = scmp.eq.s32.totalorder %s658_s22, 1 }
   0xe   : > { %p963_p9 = por %p150_p6, %p90_p1  ;;  %p711_p13 = scmp.lt.s32.totalorder %s877_s20, 2 }
   0xf   : > { %s968_s29 = scalar_select %p81_p7, %s865_s17, %s83_s24  }
  0x10   : > { %p970_p11 = por %p156_p10, %p96_p3  ;;  %s182_s5 = sand.u32 1, %s865_s17  }
  0x11   : > { %s661_s6 = sshll.u32 %s182_s5, 7  ;;  %s681_s7 = sshll.u32 %s873_s19, 11 }
  0x12   : > { %s194_s10 = scalar_lea.hbm %s1194_s2, %s681_s7  ;;  %s186_s11 = scalar_lea.vmem [#allocation2], %s661_s6 }
  0x13   : > { %s195_s12 = sshll.u32 %s186_s11, 4  ;;  %p983_p0 = pnand %p711_p13, %p953_p4  ;;  %s196_s12 = int_to_ptr.vmem [resolvable:$true] %s195_s12 }
  0x14   : > { %p664_p1 = scmp.ge.s32.totalorder %s877_s20, 1  ;;  %s183_s14 = scalar_lea.sflag [#allocation3], %s182_s5 }
  0x15   : > { %p771_p2 = pneg %p983_p0  ;;  %s782_s21 = scalar_lea.vmem %s196_s12, 2048 }
  0x16   : > { %p783_p3 = scmp.ne.s32.totalorder %s196_s12, %s782_s21  ;;  %s879_s22 = smov [#allocation2]  }
  0x17   : > { %s787_s24 = sshll.u32 %s879_s22, 4  ;;  %s788_s24 = int_to_ptr.vmem [resolvable:$false] %s787_s24 }
  0x18   : > { %p785_p5 = pnand %p783_p3, %p771_p2  ;;  %s789_s26 = scalar_lea.vmem %s788_s24, 4096 }
  0x19   : > { %p790_p7 = scmp.lt.s32.totalorder %s196_s12, %s788_s24  ;;  %p791_p10 = scmp.lt.s32.totalorder %s789_s26, %s782_s21 }
  0x1a   : > { %p786_p6 = pneg %p785_p5 }
  0x1b   : > { %p792_p12 = por %p791_p10, %p790_p7 }
  0x1d   : > { %p793_p4 = pnand %p792_p12, %p786_p6 }
  0x1f   : > { %796 = shalt.err (!%p793_p4)
}
  0x20   : > { %s880_s25 = smov 256   ;;  %s881_s5 = smov 16  }
  0x21   : > { %706 = dma.hbm_to_vmem [thread:$0]  (!%p983_p0), %s194_s10, 2048, %s196_s12, %s183_s14, %s880_s25, %s880_s25, %s881_s5  }
  0x22   : > { %p215_p13 = scmp.lt.s32.totalorder %s877_s20, 3 }
  0x24   : > { %p216_p2 = pnand %p664_p1, %p215_p13 }
  0x25   : > { %s996_s6 = sand.u32 (!%p216_p2), 1, %s861_s16  }
  0x26   : > { %219 = sbr.rel (%p216_p2) target bundleno = 290 (0x122), region = 36  ;;  %s665_s7 = sshll.u32 (!%p216_p2), %s996_s6, 7 }
  0x27   : > { %s222_s8 = scalar_lea.sflag (!%p216_p2), [#allocation3], %s996_s6  ;;  %s1002_s9 = scalar_lea.vmem (!%p216_p2), [#allocation2], %s665_s7 }
  0x2b   : > { %848 = dma.done.wait (%p959_p8), %s222_s8, 2048  }
  0x2c   : > { %850 = vsyncadd (%p959_p8), %s222_s8, 4294965248  ;;  %v882_v0 = vmov 0.0   ;;  %v883_v1 = vmov 0   ;;  %v292_v2 = vld [vmem:[%s1002_s9 + $0x78] sm:$0xff]  ;;  %v291_v3 = vld [vmem:[%s1002_s9 + $0x70] sm:$0xff]  ;;  %vm341_vm0 = vcmask 523264   ;;  %v497_v35 = vlaneseq }
  0x2d   : > { %430 = vmatprep.mubr.f32.mxu0 %v882_v0  ;;  %454 = vmatprep.mubr.f32.mxu1 %v882_v0  ;;  %v290_v4 = vld [vmem:[%s1002_s9 + $0x68] sm:$0xff]  ;;  %v289_v5 = vld [vmem:[%s1002_s9 + $0x60] sm:$0xff]  ;;  %v288_v6 = vld [vmem:[%s1002_s9 + $0x58] sm:$0xff]  ;;  %p260_p8 = scmp.lt.s32.totalorder %s869_s18, 1  ;;  %s1103_s26 = scalar_lea.vmem [#allocation5], %s665_s7 }
  0x2e   : > { %768 = vset.pattern.permute.xlu1 %v883_v1  ;;  %767 = vset.pattern.permute.xlu0 %v883_v1  ;;  %v287_v7 = vld [vmem:[%s1002_s9 + $0x50] sm:$0xff]  ;;  %v286_v8 = vld [vmem:[%s1002_s9 + $0x48] sm:$0xff]  ;;  %v285_v9 = vld [vmem:[%s1002_s9 + $0x40] sm:$0xff]  ;;  %v498_v38 = vshrl.u32 %v497_v35, 7  ;;  %s682_s7 = sshll.u32 %s869_s18, 11  ;;  %s555_s25 = sshll.u32 %s1103_s26, 4  ;;  %s1138_s25 = int_to_ptr.vmem [resolvable:$true] %s555_s25 }
  0x2f   : > { %382 = vmatprep.subr.mxu0 %v292_v2  ;;  %683 = vmatprep.subr.mxu1 %v292_v2  ;;  %v284_v10 = vld [vmem:[%s1002_s9 + $0x38] sm:$0xff]  ;;  %v283_v11 = vld [vmem:[%s1002_s9 + $0x30] sm:$0xff]  ;;  %v282_v12 = vld [vmem:[%s1002_s9 + $0x28] sm:$0xff]  ;;  %s261_s13 = scalar_select %p260_p8, %s869_s18, 1 }
  0x30   : > { %383 = vmatpush1.msra.mxu0 %v291_v3  ;;  %691 = vmatpush1.msra.mxu1 %v291_v3  ;;  %v281_v13 = vld [vmem:[%s1002_s9 + $0x20] sm:$0xff]  ;;  %v280_v14 = vld [vmem:[%s1002_s9 + $0x18] sm:$0xff]  ;;  %v279_v15 = vld [vmem:[%s1002_s9 + $0x10] sm:$0xff]  ;;  %v499_v39 = vsub.s32 0, %v498_v38  ;;  %v503_v41 = vsub.s32 1, %v498_v38  ;;  %s1136_s18 = scalar_lea.hbm %s1196_s4, %s682_s7  ;;  %s797_s27 = scalar_lea.vmem %s1138_s25, 2048 }
  0x31   : > { %384 = vmatprep.subr.mxu0 %v290_v4  ;;  %684 = vmatprep.subr.mxu1 %v290_v4  ;;  %v278_v16 = vld [vmem:[%s1002_s9 + $0x8] sm:$0xff]  ;;  %v277_v17 = vld [vmem:[%s1002_s9] sm:$0xff]  ;;  %v295_v20 = vld [vmem:[%s1193_s1 + $0x10] sm:$0xff]  ;;  %s667_s14 = sshll.u32 %s261_s13, 1  ;;  %s540_s9 = scalar_lea.sflag [#allocation4], %s996_s6 }
  0x32   : > { %385 = vmatpush1.msra.mxu0 %v289_v5  ;;  %692 = vmatpush1.msra.mxu1 %v289_v5  ;;  %v269_v18 = vld [vmem:[%s1192_s0] sm:$0xff]  ;;  %v270_v22 = vld [vmem:[%s1192_s0 + $0x8] sm:$0xff]  ;;  %v296_v24 = vld [vmem:[%s1193_s1 + $0x18] sm:$0xff]  ;;  %s266_s24 = scalar_lea.vmem %s1195_s3, %s667_s14  ;;  %p798_p12 = scmp.ne.s32.totalorder %s1138_s25, %s797_s27 }
  0x33   : > { %386 = vmatprep.subr.mxu0 %v288_v6  ;;  %685 = vmatprep.subr.mxu1 %v288_v6  ;;  %v273_v19 = vld [vmem:[%s1192_s0 + $0x20] sm:$0xff]  ;;  %v274_v23 = vld [vmem:[%s1192_s0 + $0x28] sm:$0xff]  ;;  %v271_v26 = vld [vmem:[%s1192_s0 + $0x10] sm:$0xff]  ;;  %s884_s10 = smov [#allocation5]  }
  0x34   : > { %387 = vmatpush1.msra.mxu0 %v287_v7  ;;  %693 = vmatpush1.msra.mxu1 %v287_v7  ;;  %v293_v21 = vld [vmem:[%s1193_s1] sm:$0xff]  ;;  %v294_v25 = vld [vmem:[%s1193_s1 + $0x8] sm:$0xff]  ;;  %v275_v27 = vld [vmem:[%s1192_s0 + $0x30] sm:$0xff]  ;;  %p799_p0 = pnand %p798_p12, %p963_p9  ;;  %s801_s11 = sshll.u32 %s884_s10, 4  ;;  %s802_s11 = int_to_ptr.vmem [resolvable:$false] %s801_s11 }
  0x35   : > { %388 = vmatprep.subr.mxu0 %v286_v8  ;;  %686 = vmatprep.subr.mxu1 %v286_v8  ;;  %v298_v28 = vld [vmem:[%s1193_s1 + $0x28] sm:$0xff]  ;;  %v297_v29 = vld [vmem:[%s1193_s1 + $0x20] sm:$0xff]  ;;  %v272_v30 = vld [vmem:[%s1192_s0 + $0x18] sm:$0xff]  ;;  %s803_s12 = scalar_lea.vmem %s802_s11, 4096  ;;  %p804_p3 = scmp.lt.s32.totalorder %s1138_s25, %s802_s11 }
  0x36   : > { %389 = vmatpush1.msra.mxu0 %v285_v9  ;;  %694 = vmatpush1.msra.mxu1 %v285_v9  ;;  %v276_v31 = vld [vmem:[%s1192_s0 + $0x38] sm:$0xff]  ;;  %v299_v33 = vld [vmem:[%s1193_s1 + $0x30] sm:$0xff]  ;;  %v495_v40 = vld [vmem:[%s266_s24] sm:$0x3]  ;;  %p800_p1 = pneg %p799_p0  ;;  %p805_p5 = scmp.lt.s32.totalorder %s803_s12, %s797_s27 }
  0x37   : > { %390 = vmatprep.subr.mxu0 %v284_v10  ;;  %687 = vmatprep.subr.mxu1 %v284_v10  ;;  %v300_v32 = vld [vmem:[%s1193_s1 + $0x38] sm:$0xff]  ;;  %v1095_v47 = vrot.slane %v495_v40, %v499_v39  ;;  %v1097_v50 = vrot.slane %v495_v40, %v503_v41 }
  0x38   : > { %391 = vmatpush1.msra.mxu0 %v283_v11  ;;  %695 = vmatpush1.msra.mxu1 %v283_v11  ;;  %p806_p6 = por %p805_p5, %p804_p3 }
  0x39   : > { %392 = vmatprep.subr.mxu0 %v282_v12  ;;  %688 = vmatprep.subr.mxu1 %v282_v12 }
  0x3a   : > { %393 = vmatpush1.msra.mxu0 %v281_v13  ;;  %696 = vmatpush1.msra.mxu1 %v281_v13  ;;  %p807_p7 = pnand %p806_p6, %p800_p1 }
  0x3b   : > { %394 = vmatprep.subr.mxu0 %v280_v14  ;;  %689 = vmatprep.subr.mxu1 %v280_v14 }
  0x3c   : > { %395 = vmatpush1.msra.mxu0 %v279_v15  ;;  %697 = vmatpush1.msra.mxu1 %v279_v15 }
  0x3d   : > { %396 = vmatprep.subr.mxu0 %v278_v16  ;;  %690 = vmatprep.subr.mxu1 %v278_v16 }
  0x3e   : > { %397 = vmatpush1.msra.mxu0 %v277_v17  ;;  %698 = vmatpush1.msra.mxu1 %v277_v17 }
  0x3f   : > { %668 = vmatmul.mubr.msk.f32.vlgmr.msra.gmra.mxu0 %vm341_vm0, %v269_v18  ;;  %672 = vmatmul.mubr.msk.f32.vlgmr.msra.gmra.mxu1 %vm341_vm0, %v273_v19 }
  0x40   : > { %436 = vmatprep.mubr.f32.mxu0 %v882_v0  ;;  %460 = vmatprep.mubr.f32.mxu1 %v882_v0 }
  0x41   : > { %313 = vperm.xlu1 %768, %v295_v20   ;;  %303 = vperm.xlu0 %767, %v293_v21  }
  0x43   : > { %669 = vmatmul.mubr.msk.f32.gmra.mxu0 %vm341_vm0, %v270_v22  ;;  %673 = vmatmul.mubr.msk.f32.gmra.mxu1 %vm341_vm0, %v274_v23 }
  0x44   : > { %442 = vmatprep.mubr.f32.mxu0 %v882_v0  ;;  %466 = vmatprep.mubr.f32.mxu1 %v882_v0 }
  0x45   : > { %318 = vperm.xlu1 %768, %v296_v24   ;;  %308 = vperm.xlu0 %767, %v294_v25  }
  0x47   : > { %670 = vmatmul.mubr.msk.f32.gmra.mxu0 %vm341_vm0, %v271_v26  ;;  %674 = vmatmul.mubr.msk.f32.gmra.mxu1 %vm341_vm0, %v275_v27 }
  0x48   : > { %448 = vmatprep.mubr.f32.mxu0 %v882_v0  ;;  %472 = vmatprep.mubr.f32.mxu1 %v882_v0 }
  0x49   : > { %328 = vperm.xlu1 %768, %v298_v28   ;;  %323 = vperm.xlu0 %767, %v297_v29  }
  0x4b   : > { %671 = vmatmul.mubr.msk.f32.gmra.mxu0 %vm341_vm0, %v272_v30  ;;  %675 = vmatmul.mubr.msk.f32.gmra.mxu1 %vm341_vm0, %v276_v31 }
  0x4d   : > { %338 = vperm.xlu1 %768, %v300_v32   ;;  %333 = vperm.xlu0 %767, %v299_v33  }
  0xbc   : > { %v304_v34 = vpop.permute.xlu0 %303  ;;  %v314_v36 = vpop.permute.xlu1 %313 }
  0xc0   : > { %v309_v37 = vpop.permute.xlu0 %308  ;;  %v1093_v42 = vpop.permute.xlu1 %318 }
  0xc4   : > { %v324_v43 = vpop.permute.xlu0 %323  ;;  %v329_v58 = vpop.permute.xlu1 %328 }
  0xc8   : > { %v334_v3 = vpop.permute.xlu0 %333  ;;  %v339_v20 = vpop.permute.xlu1 %338 }
  0xff   : > { %v432_v44 = vpop.f32.mrf.mxu0  ;;  %v456_v45 = vpop.f32.mrf.mxu1 }
 0x100   : > { %v433_v46 = vadd.f32 %v432_v44, %v304_v34  ;;  %v457_v48 = vadd.f32 %v456_v45, %v324_v43 }
 0x101   : > { %v434_v49 = vpop.f32.mrf.mxu0  ;;  %v458_v51 = vpop.f32.mrf.mxu1 }
 0x102   : > { %v479_v52 = vmax.f32 %v433_v46, 0.0  ;;  %v487_v53 = vmax.f32 %v457_v48, 0.0  ;;  %v435_v54 = vadd.f32 %v434_v49, %v304_v34  ;;  %v459_v55 = vadd.f32 %v458_v51, %v324_v43 }
 0x103   : > { %v438_v56 = vpop.f32.mrf.mxu0  ;;  %v462_v57 = vpop.f32.mrf.mxu1 }
 0x104   : > { %v507_v59 = vmul.f32 %v1095_v47, %v479_v52  ;;  %v515_v60 = vmul.f32 %v1095_v47, %v487_v53  ;;  %v480_v61 = vmax.f32 %v435_v54, 0.0  ;;  %v488_v62 = vmax.f32 %v459_v55, 0.0 }
 0x105   : > { %v439_v63 = vadd.f32 %v438_v56, %v309_v37  ;;  %v463_v0 = vadd.f32 %v462_v57, %v329_v58  ;;  %v440_v1 = vpop.f32.mrf.mxu0  ;;  %v464_v2 = vpop.f32.mrf.mxu1 }
 0x106   : > { %523 = vst [vmem:[%s1103_s26] sm:$0xff] %v507_v59  ;;  %531 = vst [vmem:[%s1103_s26 + $0x40] sm:$0xff] %v515_v60  ;;  %v508_v4 = vmul.f32 %v1097_v50, %v480_v61  ;;  %v516_v5 = vmul.f32 %v1097_v50, %v488_v62  ;;  %v441_v6 = vadd.f32 %v440_v1, %v309_v37 }
 0x107   : > { %v465_v7 = vadd.f32 %v464_v2, %v329_v58  ;;  %v481_v8 = vmax.f32 %v439_v63, 0.0  ;;  %v489_v9 = vmax.f32 %v463_v0, 0.0  ;;  %v444_v10 = vpop.f32.mrf.mxu0  ;;  %v468_v11 = vpop.f32.mrf.mxu1 }
 0x108   : > { %524 = vst [vmem:[%s1103_s26 + $0x8] sm:$0xff] %v508_v4  ;;  %532 = vst [vmem:[%s1103_s26 + $0x48] sm:$0xff] %v516_v5  ;;  %v482_v12 = vmax.f32 %v441_v6, 0.0  ;;  %v445_v14 = vadd.f32 %v444_v10, %v314_v36  ;;  %v469_v15 = vadd.f32 %v468_v11, %v334_v3 }
 0x109   : > { %v490_v13 = vmax.f32 %v465_v7, 0.0  ;;  %v509_v16 = vmul.f32 %v1095_v47, %v481_v8  ;;  %v517_v17 = vmul.f32 %v1095_v47, %v489_v9  ;;  %v446_v18 = vpop.f32.mrf.mxu0  ;;  %v470_v19 = vpop.f32.mrf.mxu1 }
 0x10a   : > { %v510_v21 = vmul.f32 %v1097_v50, %v482_v12  ;;  %v483_v23 = vmax.f32 %v445_v14, 0.0  ;;  %v491_v24 = vmax.f32 %v469_v15, 0.0  ;;  %v447_v25 = vadd.f32 %v446_v18, %v314_v36 }
 0x10b   : > { %v518_v22 = vmul.f32 %v1097_v50, %v490_v13  ;;  %525 = vst [vmem:[%s1103_s26 + $0x10] sm:$0xff] %v509_v16  ;;  %533 = vst [vmem:[%s1103_s26 + $0x50] sm:$0xff] %v517_v17  ;;  %v471_v26 = vadd.f32 %v470_v19, %v334_v3  ;;  %v450_v27 = vpop.f32.mrf.mxu0  ;;  %v474_v28 = vpop.f32.mrf.mxu1 }
 0x10c   : > { %526 = vst [vmem:[%s1103_s26 + $0x18] sm:$0xff] %v510_v21  ;;  %v511_v29 = vmul.f32 %v1095_v47, %v483_v23  ;;  %v519_v30 = vmul.f32 %v1095_v47, %v491_v24  ;;  %v451_v31 = vadd.f32 %v450_v27, %v1093_v42  ;;  %v475_v32 = vadd.f32 %v474_v28, %v339_v20 }
 0x10d   : > { %534 = vst [vmem:[%s1103_s26 + $0x58] sm:$0xff] %v518_v22  ;;  %v484_v33 = vmax.f32 %v447_v25, 0.0  ;;  %v492_v34 = vmax.f32 %v471_v26, 0.0  ;;  %v452_v35 = vpop.f32.mrf.mxu0  ;;  %v476_v37 = vpop.f32.mrf.mxu1 }
 0x10e   : > { %527 = vst [vmem:[%s1103_s26 + $0x20] sm:$0xff] %v511_v29  ;;  %535 = vst [vmem:[%s1103_s26 + $0x60] sm:$0xff] %v519_v30  ;;  %v485_v36 = vmax.f32 %v451_v31, 0.0  ;;  %v493_v38 = vmax.f32 %v475_v32, 0.0  ;;  %v453_v39 = vadd.f32 %v452_v35, %v1093_v42  ;;  %v477_v40 = vadd.f32 %v476_v37, %v339_v20 }
 0x10f   : > { %v512_v41 = vmul.f32 %v1097_v50, %v484_v33  ;;  %v520_v43 = vmul.f32 %v1097_v50, %v492_v34 }
 0x110   : > { %v513_v44 = vmul.f32 %v1095_v47, %v485_v36  ;;  %v521_v45 = vmul.f32 %v1095_v47, %v493_v38  ;;  %v486_v46 = vmax.f32 %v453_v39, 0.0  ;;  %v494_v48 = vmax.f32 %v477_v40, 0.0 }
 0x111   : > { %528 = vst [vmem:[%s1103_s26 + $0x28] sm:$0xff] %v512_v41  ;;  %536 = vst [vmem:[%s1103_s26 + $0x68] sm:$0xff] %v520_v43 }
 0x112   : > { %529 = vst [vmem:[%s1103_s26 + $0x30] sm:$0xff] %v513_v44  ;;  %537 = vst [vmem:[%s1103_s26 + $0x70] sm:$0xff] %v521_v45  ;;  %v514_v42 = vmul.f32 %v1097_v50, %v486_v46  ;;  %v522_v47 = vmul.f32 %v1097_v50, %v494_v48 }
 0x114   : > { %530 = vst [vmem:[%s1103_s26 + $0x38] sm:$0xff] %v514_v42  ;;  %538 = vst [vmem:[%s1103_s26 + $0x78] sm:$0xff] %v522_v47 }
 0x115   : > { %810 = shalt.err (!%p807_p7)
}
 0x116   : > { %s811_s13 = scalar_lea.hbm %s1136_s18, 2048  ;;  %s815_s22 = scalar_lea.hbm %s1196_s4, 4096 }
 0x117   : > { %p812_p10 = scmp.ne.s32.totalorder %s1136_s18, %s811_s13  ;;  %p816_p2 = scmp.lt.s32.totalorder %s1136_s18, %s1196_s4 }
 0x118   : > { %p817_p8 = scmp.lt.s32.totalorder %s815_s22, %s811_s13 }
 0x119   : > { %p813_p4 = pnand %p812_p10, %p963_p9 }
 0x11a   : > { %p818_p12 = por %p817_p8, %p816_p2 }
 0x11b   : > { %p814_p13 = pneg %p813_p4 }
 0x11d   : > { %p819_p0 = pnand %p818_p12, %p814_p13 }
 0x11f   : > { %822 = shalt.err (!%p819_p0)
}
 0x120   : > { %s885_s7 = smov 256   ;;  %s886_s5 = smov 16  }
 0x121   : > { %701 = dma.vmem_to_hbm [thread:$0]  (%p963_p9), %s1138_s25, 2048, %s1136_s18, %s540_s9, %s885_s7, %s885_s7, %s886_s5  }
 0x122 PF: > { %s570_s8 = sand.u32 1, %s857_s15   ;;  %p1202_p1 = scmp.ge.s32.totalorder %s877_s20, 2 }
 0x123   : > { %s571_s27 = scalar_lea.sflag [#allocation4], %s570_s8 }
 0x124   : > { %p708_p3 = pnand %p1202_p1, %p970_p11 }
 0x126   : > { %p709_p5 = pneg %p708_p3 }
 0x128   : > { %852 = dma.done.wait (%p709_p5), %s571_s27, 2048  }
 0x129   : > { %854 = vsyncadd (%p709_p5), %s571_s27, 4294965248  ;;  %s20_s20 = sadd.s32 1, %s877_s20   ;;  %s1203_s15 = smov %s861_s16 }
 0x12a   : > { %p17_p6 = scmp.ge.s32.totalorder %s20_s20, 4   ;;  %s1204_s16 = smov %s865_s17 }
 0x12b   : > { %s1205_s17 = smov %s968_s29  ;;  %s1206_s18 = smov %s873_s19 }
 0x12c   : > { %s1207_s19 = smov %s1209_s23  ;;  %19 = sbr.rel (!%p17_p6) target bundleno = 6 (0x6), region = 84 }
 0x131   :  { %576 = vsyncpa [#allocation3], 1 }
 0x132   :  { %578 = vsyncpa [#allocation3 + $0x1], 1 }
 0x133   :  { %579 = vsyncpa [#allocation4], 1 }
 0x134   :  { %581 = vsyncpa [#allocation4 + $0x1], 1 }

</bundles_post_ra>
